<compile_context>
chip_gen: v5e
topology: v5e:2x2
jax: 0.10.0
libtpu: 0.0.40
codegen_flags: <defaults>
</compile_context>

<pallas_src>
import functools

import jax
import jax.numpy as jnp
from jax.experimental import pallas as pl
from jax.experimental.pallas import tpu as pltpu

SUBLANES = 8
_CHUNK_ROWS = 512          # in-kernel compute chunk (bounds VMEM temporaries)
_X_PAD = -1.0e4            # loss-neutral pad: BCE(-1e4, 0) == 0.0 exactly in f32


def _ceil_div(a, b):
    return -(-a // b)


def _round_up(a, b):
    return _ceil_div(a, b) * b


@functools.lru_cache(maxsize=1)
def _has_big_vmem():
    """True only on chips known to have 128 MiB VMEM (v5e / v6e)."""
    try:
        kind = jax.devices()[0].device_kind.lower()
    except Exception:
        return False
    if "7" in kind:            # v7x: only 64 MiB physical VMEM
        return False
    return ("v5e" in kind) or ("v5 lite" in kind) or ("v6" in kind)


def _vmem_limit_bytes():
    return (96 if _has_big_vmem() else 48) * 1024 * 1024


def _choose_lane_width(n):
    """Largest lane width in {512, 256, 128} dividing n (=> zero-copy reshape)."""
    for lane_w in (512, 256, 128):          # prefer widths giving >= 8 rows
        if n % lane_w == 0 and n >= SUBLANES * lane_w:
            return lane_w, False
    for lane_w in (512, 256, 128):
        if n % lane_w == 0:
            return lane_w, False
    # Misaligned element count: a pad (one extra read+write) is unavoidable here.
    return (512 if n >= SUBLANES * 512 else 128), True


def _to_slab(a, rows, lane_w, pad_value, needs_pad):
    """[rows, lane_w] view of the flattened array (free reshape unless padding)."""
    flat = a.reshape(-1)
    if needs_pad:
        flat = jnp.pad(flat, (0, rows * lane_w - flat.shape[0]),
                       constant_values=pad_value)
    return flat.reshape(rows, lane_w)


def _bce_with_logits(x, y):
    # Numerically stable; matches torch BCEWithLogitsLoss(reduction='none'):
    #   loss = max(x, 0) - x*y + log(1 + exp(-|x|))
    return jnp.maximum(x, 0.0) - x * y + jnp.log1p(jnp.exp(-jnp.abs(x)))


def _make_reduce_kernel(rows, block_rows, lane_w, has_w):
    chunk = _CHUNK_ROWS if block_rows % _CHUNK_ROWS == 0 else block_rows
    nchunks = block_rows // chunk

    def kernel(*args):
        if has_w:
            x_ref, y_ref, w_ref, out_ref = args
        else:
            x_ref, y_ref, out_ref = args
            w_ref = None
        i = pl.program_id(0)

        @pl.when(i == 0)
        def _():
            out_ref[...] = jnp.zeros_like(out_ref)

        def chunk_body(k, carry):
            r0 = pl.multiple_of(k * chunk, chunk)
            x = x_ref[pl.ds(r0, chunk), :].astype(jnp.float32)
            y = y_ref[pl.ds(r0, chunk), :].astype(jnp.float32)
            loss = _bce_with_logits(x, y)
            if has_w:
                loss = loss * w_ref[pl.ds(r0, chunk), :].astype(jnp.float32)
            # Rows past the true row count only exist in the ragged last block
            # and hold unspecified data -> zero their contribution (pure VPU
            # compare+select; also neutralizes any NaN/Inf garbage there).
            row_idx = (i * block_rows + r0
                       + jax.lax.broadcasted_iota(jnp.int32, (chunk, lane_w), 0))
            loss = jnp.where(row_idx < rows, loss, 0.0)
            # Row-group partial sum into the resident (8, lane_w) accumulator:
            # leading-dim split is layout-preserving -> plain vreg-wise VPU adds.
            out_ref[...] += loss.reshape(chunk // SUBLANES, SUBLANES,
                                         lane_w).sum(axis=0)
            return carry

        jax.lax.fori_loop(0, nchunks, chunk_body, 0)

    return kernel


def _make_elementwise_kernel(block_rows, lane_w, has_w):
    chunk = _CHUNK_ROWS if block_rows % _CHUNK_ROWS == 0 else block_rows
    nchunks = block_rows // chunk

    def kernel(*args):
        if has_w:
            x_ref, y_ref, w_ref, out_ref = args
        else:
            x_ref, y_ref, out_ref = args
            w_ref = None

        def chunk_body(k, carry):
            r0 = pl.multiple_of(k * chunk, chunk)
            x = x_ref[pl.ds(r0, chunk), :].astype(jnp.float32)
            y = y_ref[pl.ds(r0, chunk), :].astype(jnp.float32)
            loss = _bce_with_logits(x, y)
            if has_w:
                loss = loss * w_ref[pl.ds(r0, chunk), :].astype(jnp.float32)
            out_ref[pl.ds(r0, chunk), :] = loss.astype(out_ref.dtype)
            return carry

        jax.lax.fori_loop(0, nchunks, chunk_body, 0)

    return kernel


def nbs_loss(inp, target, w=None, reduction="mean"):
    """JAX/Pallas equivalent of NbsLoss.forward."""
    orig_shape = inp.shape
    n = int(inp.size)

    if n == 0:  # degenerate edge case
        if reduction == "mean":
            return jnp.float32(float("nan"))
        if reduction == "sum":
            return jnp.float32(0.0)
        return jnp.zeros(orig_shape, inp.dtype)

    # Classify w so we never materialize a broadcasted copy needlessly.
    if w is None:
        w_mode = "none"
    else:
        w = jnp.asarray(w)
        if w.size == 1:
            w_mode = "scalar"              # folded into a post-kernel multiply
        elif tuple(w.shape) == tuple(orig_shape):
            w_mode = "full"
        else:
            # TODO(synk): stream low-rank / per-channel weights via SMEM/VMEM
            # broadcast instead of materializing the full copy in HBM.
            w = jnp.broadcast_to(w, orig_shape)
            w_mode = "full"

    lane_w, needs_pad = _choose_lane_width(n)
    rows = _ceil_div(n, lane_w)

    x2 = _to_slab(inp, rows, lane_w, _X_PAD, needs_pad)
    y2 = _to_slab(target, rows, lane_w, 0, needs_pad)
    operands = [x2, y2]
    if w_mode == "full":
        operands.append(_to_slab(w, rows, lane_w, 0, needs_pad))

    big_vmem = _has_big_vmem()
    vmem_limit = _vmem_limit_bytes()

    if reduction in ("mean", "sum"):
        max_bytes = (8 if big_vmem else 4) * 1024 * 1024   # per input per step
        block_rows = max(SUBLANES, min(max_bytes // (lane_w * 4),
                                       _round_up(rows, SUBLANES)))
        nblocks = _ceil_div(rows, block_rows)
        kernel = _make_reduce_kernel(rows, block_rows, lane_w, w_mode == "full")

        partials = pl.pallas_call(
            kernel,
            out_shape=jax.ShapeDtypeStruct((SUBLANES, lane_w), jnp.float32),
            grid_spec=pltpu.PrefetchScalarGridSpec(
                num_scalar_prefetch=0,
                grid=(nblocks,),
                in_specs=[pl.BlockSpec((block_rows, lane_w), lambda i: (i, 0))]
                * len(operands),
                out_specs=pl.BlockSpec((SUBLANES, lane_w), lambda i: (0, 0)),
            ),
            compiler_params=pltpu.CompilerParams(
                dimension_semantics=("arbitrary",),
                vmem_limit_bytes=vmem_limit,
            ),
        )(*operands)

        total = jnp.sum(partials)
        if w_mode == "scalar":
            total = total * w.astype(jnp.float32).reshape(())
        if reduction == "mean":
            # torch .mean() divides by the element count, independent of w.
            return total / jnp.float32(n)
        return total

    # reduction == 'none' (or anything else, matching the torch `else` branch):
    out_dtype = jnp.result_type(inp.dtype, w.dtype) if w is not None else inp.dtype
    max_bytes = (4 if big_vmem else 2) * 1024 * 1024       # per buffer per step
    block_rows = max(SUBLANES, min(max_bytes // (lane_w * 4),
                                   _round_up(rows, SUBLANES)))
    nblocks = _ceil_div(rows, block_rows)
    tile_spec = pl.BlockSpec((block_rows, lane_w), lambda i: (i, 0))
    kernel = _make_elementwise_kernel(block_rows, lane_w, w_mode == "full")

    out2 = pl.pallas_call(
        kernel,
        out_shape=jax.ShapeDtypeStruct((rows, lane_w), out_dtype),
        grid_spec=pltpu.PrefetchScalarGridSpec(
            num_scalar_prefetch=0,
            grid=(nblocks,),
            in_specs=[tile_spec] * len(operands),
            out_specs=tile_spec,
        ),
        compiler_params=pltpu.CompilerParams(
            dimension_semantics=("parallel",),
            vmem_limit_bytes=vmem_limit,
        ),
    )(*operands)

    if w_mode == "scalar":
        out2 = out2 * w.reshape(()).astype(out_dtype)

    flat = out2.reshape(-1)
    if needs_pad:
        # TODO(synk): misaligned sizes pay one extra output copy for this slice.
        flat = flat[:n]
    return flat.reshape(orig_shape)


def _reference(inp, target, w=None, reduction="mean"):
    x = inp.astype(jnp.float32)
    y = target.astype(jnp.float32)
    loss = jnp.maximum(x, 0.0) - x * y + jnp.log1p(jnp.exp(-jnp.abs(x)))
    if w is not None:
        loss = loss * jnp.asarray(w).astype(jnp.float32)
    if reduction == "mean":
        return loss.mean()
    elif reduction == "sum":
        return loss.sum()
    return loss


if __name__ == "__main__":
    key = jax.random.PRNGKey(0)
    k1, k2, k3 = jax.random.split(key, 3)

    # NCHW logits / targets / per-element weights
    shape = (2, 4, 16, 16)
    logits = jax.random.normal(k1, shape, jnp.float32)
    targets = (jax.random.uniform(k2, shape) > 0.5).astype(jnp.float32)
    weights = jax.random.uniform(k3, shape, jnp.float32)
    w_scalar = jnp.float32(0.37)

    checks = [
        ("mean_w", dict(w=weights, reduction="mean")),
        ("mean_now", dict(reduction="mean")),                 # 2-input kernel
        ("mean_wscalar", dict(w=w_scalar, reduction="mean")),  # scalar-w fold
        ("sum_w", dict(w=weights, reduction="sum")),
        ("none_w", dict(w=weights, reduction="none")),
        ("none_now", dict(reduction="none")),
    ]
    for name, kw in checks:
        out = jax.block_until_ready(nbs_loss(logits, targets, **kw))
        ref = _reference(logits, targets, **kw)
        assert jnp.allclose(out, ref, atol=1e-5, rtol=1e-5), (name, out, ref)

    # Non-128-divisible element count: exercises the padded fallback path.
    shape2 = (3, 5, 33, 47)
    l2 = jax.random.normal(k1, shape2, jnp.float32)
    t2 = (jax.random.uniform(k2, shape2) > 0.5).astype(jnp.float32)
    for red in ("mean", "none"):
        o = jax.block_until_ready(nbs_loss(l2, t2, reduction=red))
        r = _reference(l2, t2, reduction=red)
        assert jnp.allclose(o, r, atol=1e-5, rtol=1e-5), (red, o, r)

    # Divisible by 128 but not 256/512: zero-copy lane_w=128 path with a ragged
    # (block_rows > rows) last block handled by the in-kernel row mask.
    shape3 = (3, 384)
    l3 = jax.random.normal(k3, shape3, jnp.float32)
    t3 = (jax.random.uniform(k1, shape3) > 0.5).astype(jnp.float32)
    o3 = jax.block_until_ready(nbs_loss(l3, t3, reduction="mean"))
    r3 = _reference(l3, t3, reduction="mean")
    assert jnp.allclose(o3, r3, atol=1e-5, rtol=1e-5), (o3, r3)

    print("KERNEL_OK")
</pallas_src>

<mosaic_0001>
module attributes {stable_mosaic.version = 11 : i64} {
  func.func @kernel(%arg0: i32, %arg1: memref<8x256xf32, #tpu.memory_space<vmem>>, %arg2: memref<8x256xf32, #tpu.memory_space<vmem>>, %arg3: memref<8x256xf32, #tpu.memory_space<vmem>>, %arg4: memref<8x256xf32, #tpu.memory_space<vmem>>) attributes {dimension_semantics = [#tpu.dimension_semantics<arbitrary>], iteration_bounds = array<i64: 1>, scalar_prefetch = 0 : i64, scratch_operands = 0 : i64, tpu.core_type = #tpu.core_type<tc>, window_params = [{transform_indices = @transform_0, window_bounds = array<i64: 8, 256>}, {transform_indices = @transform_1, window_bounds = array<i64: 8, 256>}, {transform_indices = @transform_2, window_bounds = array<i64: 8, 256>}, {pipeline_mode = #tpu.pipeline_mode<synchronous>, transform_indices = @transform_3, window_bounds = array<i64: 8, 256>}]} {
    %c0_i32 = arith.constant 0 : i32
    %0 = arith.cmpi eq, %arg0, %c0_i32 : i32
    %1 = arith.extui %0 : i1 to i32
    %c0_i32_0 = arith.constant 0 : i32
    %2 = arith.cmpi ne, %1, %c0_i32_0 : i32
    scf.if %2 {
      %cst_13 = arith.constant 0.000000e+00 : f32
      %36 = vector.broadcast %cst_13 : f32 to vector<8x256xf32>
      %c0_14 = arith.constant 0 : index
      %c0_15 = arith.constant 0 : index
      %37 = vector.load %arg4[%c0_14, %c0_15] : memref<8x256xf32, #tpu.memory_space<vmem>>, vector<8x256xf32>
      tpu.vector_store %arg4[%c0_14, %c0_15], %36 {strides = array<i32>} : memref<8x256xf32, #tpu.memory_space<vmem>>, vector<8x256xf32>,
    } else {
    }
    %c0_i32_1 = arith.constant 0 : i32
    %c8_i32 = arith.constant 8 : i32
    %3 = arith.muli %c0_i32_1, %c8_i32 : i32
    %4 = tpu.assume_multiple %3, 8 : i32
    %5 = arith.index_cast %4 : i32 to index
    %c0 = arith.constant 0 : index
    %6 = vector.load %arg1[%5, %c0] : memref<8x256xf32, #tpu.memory_space<vmem>>, vector<8x256xf32>
    %7 = arith.index_cast %4 : i32 to index
    %c0_2 = arith.constant 0 : index
    %8 = vector.load %arg2[%7, %c0_2] : memref<8x256xf32, #tpu.memory_space<vmem>>, vector<8x256xf32>
    %cst = arith.constant 0.000000e+00 : f32
    %9 = vector.broadcast %cst : f32 to vector<8x256xf32>
    %10 = arith.maximumf %6, %9 : vector<8x256xf32>
    %11 = arith.mulf %6, %8 : vector<8x256xf32>
    %12 = arith.subf %10, %11 : vector<8x256xf32>
    %13 = math.absf %6 : vector<8x256xf32>
    %cst_3 = arith.constant 0.000000e+00 : f32
    %14 = vector.broadcast %cst_3 : f32 to vector<8x256xf32>
    %15 = arith.subf %14, %13 : vector<8x256xf32>
    %16 = math.exp %15 : vector<8x256xf32>
    %17 = math.log1p %16 : vector<8x256xf32>
    %18 = arith.addf %12, %17 : vector<8x256xf32>
    %19 = arith.index_cast %4 : i32 to index
    %c0_4 = arith.constant 0 : index
    %20 = vector.load %arg3[%19, %c0_4] : memref<8x256xf32, #tpu.memory_space<vmem>>, vector<8x256xf32>
    %21 = arith.mulf %18, %20 : vector<8x256xf32>
    %c8_i32_5 = arith.constant 8 : i32
    %22 = arith.muli %arg0, %c8_i32_5 : i32
    %23 = arith.addi %22, %4 : i32
    %24 = tpu.iota {dimensions = array<i32: 0>} : vector<8x256xi32>
    %25 = vector.broadcast %23 : i32 to vector<8x256xi32>
    %26 = arith.addi %25, %24 : vector<8x256xi32>
    %c8_i32_6 = arith.constant 8 : i32
    %27 = vector.broadcast %c8_i32_6 : i32 to vector<8x256xi32>
    %28 = arith.cmpi slt, %26, %27 : vector<8x256xi32>
    %cst_7 = arith.constant 0.000000e+00 : f32
    %29 = vector.broadcast %cst_7 : f32 to vector<8x256xf32>
    %30 = arith.select %28, %21, %29 : vector<8x256xi1>, vector<8x256xf32>
    %c0_8 = arith.constant 0 : index
    %c0_9 = arith.constant 0 : index
    %31 = vector.load %arg4[%c0_8, %c0_9] : memref<8x256xf32, #tpu.memory_space<vmem>>, vector<8x256xf32>
    %32 = vector.shape_cast %30 : vector<8x256xf32> to vector<1x8x256xf32>
    %cst_10 = arith.constant dense<0.000000e+00> : vector<8x256xf32>
    %33 = vector.multi_reduction <add>, %32, %cst_10 [0] : vector<1x8x256xf32> to vector<8x256xf32>
    %34 = arith.addf %31, %33 : vector<8x256xf32>
    %c0_11 = arith.constant 0 : index
    %c0_12 = arith.constant 0 : index
    %35 = vector.load %arg4[%c0_11, %c0_12] : memref<8x256xf32, #tpu.memory_space<vmem>>, vector<8x256xf32>
    tpu.vector_store %arg4[%c0_11, %c0_12], %34 {strides = array<i32>} : memref<8x256xf32, #tpu.memory_space<vmem>>, vector<8x256xf32>,
    %c1_i32 = arith.constant 1 : i32
    return
  }
  func.func @transform_0(%arg0: i32) -> (i32, i32) {
    %c0_i32 = arith.constant 0 : i32
    %c0_i32_0 = arith.constant 0 : i32
    return %arg0, %c0_i32 : i32, i32
  }
  func.func @transform_1(%arg0: i32) -> (i32, i32) {
    %c0_i32 = arith.constant 0 : i32
    %c0_i32_0 = arith.constant 0 : i32
    return %arg0, %c0_i32 : i32, i32
  }
  func.func @transform_2(%arg0: i32) -> (i32, i32) {
    %c0_i32 = arith.constant 0 : i32
    %c0_i32_0 = arith.constant 0 : i32
    return %arg0, %c0_i32 : i32, i32
  }
  func.func @transform_3(%arg0: i32) -> (i32, i32) {
    %c0_i32 = arith.constant 0 : i32
    %c0_i32_0 = arith.constant 0 : i32
    %c0_i32_1 = arith.constant 0 : i32
    return %c0_i32, %c0_i32_0 : i32, i32
  }
}

</mosaic_0001>

<bundles_post_ra>
// kernel: tpu_custom_call.1
= control target key start
LH: loop header
LB: loop body
LE: loop exit
PB: predicated region body
PF: predicated region fallthrough
CT: control target
= control target key end

     0   :  { %8 = vsyncpa [#allocation3], 0  ;;  %s297_s0 = inlined_call_operand.hbm [shape: f32[8,256], index: 0, kind: input, shape index: {}]   ;;  %s298_s1 = inlined_call_operand.hbm [shape: f32[8,256], index: 1, kind: input, shape index: {}]   ;;  %s299_s2 = inlined_call_operand.hbm [shape: f32[8,256], index: 2, kind: input, shape index: {}]   ;;  %s300_s3 = inlined_call_operand.hbm [shape: f32[8,256], index: 3, kind: output, shape index: {}]  }
   0x1   :  { %9 = vsyncpa [#allocation6], 0  ;;  %s27_s14 = sshll.u32 %s298_s1, 4  ;;  %s28_s14 = int_to_ptr.hbm [resolvable:$true] %s27_s14 }
   0x2   :  { %10 = vsyncpa [#allocation4], 0  ;;  %s261_s15 = smov [#allocation5]   ;;  %s16_s19 = sshll.u32 %s297_s0, 4  ;;  %s17_s19 = int_to_ptr.hbm [resolvable:$true] %s16_s19 }
   0x3   :  { %s29_s16 = sshll.u32 %s261_s15, 4  ;;  %s262_s20 = smov [#allocation2]   ;;  %s30_s16 = int_to_ptr.vmem [resolvable:$true] %s29_s16 }
   0x4   :  { %32 = dma.hbm_to_vmem [thread:$0]  %s28_s14, 256, %s30_s16, [#allocation6]  }
   0x5   :  { %s18_s21 = sshll.u32 %s262_s20, 4  ;;  %s38_s24 = sshll.u32 %s299_s2, 4  ;;  %s19_s21 = int_to_ptr.vmem [resolvable:$true] %s18_s21  ;;  %s39_s24 = int_to_ptr.hbm [resolvable:$true] %s38_s24 }
   0x6   :  { %21 = dma.hbm_to_vmem [thread:$0]  %s17_s19, 256, %s19_s21, [#allocation3]  }
   0x7   :  { %s263_s1 = smov [#allocation7]  }
   0x8   :  { %s40_s25 = sshll.u32 %s263_s1, 4  ;;  %s41_s25 = int_to_ptr.vmem [resolvable:$true] %s40_s25 }
   0x9   :  { %43 = dma.hbm_to_vmem [thread:$0]  %s39_s24, 256, %s41_s25, [#allocation6]  }
   0xa   :  { %255 = dma.done.wait [#allocation3], 256  }
   0xb   :  { %256 = vsyncadd [#allocation3], 4294967040 }
   0xc   :  { %257 = dma.done.wait [#allocation6], 512  }
   0xd   :  { %258 = vsyncadd [#allocation6], 4294966784  ;;  %v65_v0 = vld [vmem:[#allocation2] sm:$0xff]  ;;  %v66_v2 = vld [vmem:[#allocation2 + $0x8] sm:$0xff]  ;;  %s264_s0 = smov [#allocation8]   ;;  %s135_s28 = sshll.u32 %s300_s3, 4  ;;  %s136_s28 = int_to_ptr.hbm [resolvable:$true] %s135_s28 }
   0xe   :  { %v77_v1 = vand.u32 2147483647, %v65_v0  ;;  %v78_v3 = vand.u32 2147483647, %v66_v2  ;;  %v69_v12 = vld [vmem:[#allocation5] sm:$0xff]  ;;  %v70_v15 = vld [vmem:[#allocation5 + $0x8] sm:$0xff] }
   0xf   :  { %v71_v17 = vmax.f32 %v65_v0, 0.0  ;;  %v73_v18 = vmul.f32 %v69_v12, %v65_v0  ;;  %v72_v21 = vmax.f32 %v66_v2, 0.0  ;;  %v74_v22 = vmul.f32 %v70_v15, %v66_v2  ;;  %v107_v33 = vld [vmem:[#allocation7] sm:$0xff]  ;;  %v108_v36 = vld [vmem:[#allocation7 + $0x8] sm:$0xff]  ;;  %s133_s2 = sshll.u32 %s264_s0, 4  ;;  %s134_s2 = int_to_ptr.vmem [resolvable:$true] %s133_s2 }
  0x10   :  { %v79_v4 = vsub.f32 0.0, %v77_v1  ;;  %v80_v5 = vsub.f32 0.0, %v78_v3 }
  0x11   :  { %v75_v26 = vsub.f32 %v71_v17, %v73_v18  ;;  %v76_v30 = vsub.f32 %v72_v21, %v74_v22 }
  0x12   :  { %v81_v6 = vmul.f32 1.442695, %v79_v4  ;;  %v83_v7 = vmul.f32 1.442695, %v80_v5 }
  0x14   :  { %151 = vpow2.f32 %v81_v6 }
  0x15   :  { %153 = vpow2.f32 %v83_v7 }
  0x1a   :  { %v152_v8 = vpop.eup %151 }
  0x1b   :  { %v154_v9 = vpop.eup %153  ;;  %v85_v10 = vadd.f32 1.0, %v152_v8  ;;  %v88_v11 = vmul.f32 -0.5, %v152_v8  ;;  %v91_v19 = vand.u32 2147483647, %v152_v8 }
  0x1c   :  { %v94_v13 = vadd.f32 1.0, %v154_v9  ;;  %v97_v14 = vmul.f32 -0.5, %v154_v9  ;;  %v100_v23 = vand.u32 2147483647, %v154_v9 }
  0x1d   :  { %155 = vlog2.f32 %v85_v10  ;;  %v89_v16 = vadd.f32 1.0, %v88_v11  ;;  %vm92_vm0 = vcmp.lt.f32.partialorder %v91_v19, 0.0004427343 }
  0x1e   :  { %157 = vlog2.f32 %v94_v13  ;;  %v98_v20 = vadd.f32 1.0, %v97_v14  ;;  %vm101_vm1 = vcmp.lt.f32.partialorder %v100_v23, 0.0004427343 }
  0x1f   :  { %v90_v24 = vmul.f32 %v152_v8, %v89_v16 }
  0x20   :  { %v99_v27 = vmul.f32 %v154_v9, %v98_v20 }
  0x23   :  { %v156_v25 = vpop.eup %155 }
  0x24   :  { %v158_v28 = vpop.eup %157  ;;  %v87_v29 = vmul.f32 0.6931472, %v156_v25 }
  0x25   :  { %v96_v31 = vmul.f32 0.6931472, %v158_v28 }
  0x26   :  { %v93_v32 = vsel %vm92_vm0, %v90_v24, %v87_v29 }
  0x27   :  { %v103_v34 = vadd.f32 %v93_v32, %v75_v26  ;;  %v102_v35 = vsel %vm101_vm1, %v99_v27, %v96_v31 }
  0x28   :  { %v104_v37 = vadd.f32 %v102_v35, %v76_v30 }
  0x29   :  { %v109_v38 = vmul.f32 %v107_v33, %v103_v34 }
  0x2a   :  { %v110_v39 = vmul.f32 %v108_v36, %v104_v37 }
  0x2b   :  { %126 = vst [vmem:[#allocation8] sm:$0xff] %v109_v38 }
  0x2c   :  { %127 = vst [vmem:[#allocation8 + $0x8] sm:$0xff] %v110_v39 }
  0x2d   :  { %138 = dma.vmem_to_hbm [thread:$0]  %s134_s2, 256, %s136_s28, [#allocation4]  }
  0x2e   :  { %259 = dma.done.wait [#allocation4], 256  }
  0x2f   :  { %260 = vsyncadd [#allocation4], 4294967040 }
  0x30   :  { %143 = vsyncpa [#allocation3], 1 }
  0x31   :  { %144 = vsyncpa [#allocation6], 1 }
  0x32   :  { %145 = vsyncpa [#allocation4], 1 }

</bundles_post_ra>
